<compile_context>
chip_gen: v6e
topology: v6e:2x2x1
jax: 0.10.0
libtpu: 0.0.40
codegen_flags: <defaults>
</compile_context>

<pallas_src>
import functools

import jax
import jax.numpy as jnp
import numpy as np
from jax.experimental import pallas as pl
from jax.experimental.pallas import tpu as pltpu


def _r8(n):
    return ((n + 7) // 8) * 8


def _r128(n):
    return ((n + 127) // 128) * 128


# Row indices of the 1-D parameter vectors inside the "vec" block of the slab.
(_LN0W, _LN0B, _B1, _LN1W, _LN1B, _B2, _LN2W, _LN2B,
 _BR, _BZ, _BIN, _BHN, _LNRW, _LNRB, _BACT) = range(15)
_N_VEC_ROWS = 16            # 15 used, padded to a sublane multiple


def _layout(D, H, A):
    """Row layout of the single packed parameter slab (all offsets 8-aligned)."""
    cols = max(D, H, A)
    off = {}
    r = 0

    def blk(name, rows):
        nonlocal r
        off[name] = r
        r += _r8(rows)

    blk("w1", D)          # (D, H)   MLP layer 1
    blk("w2", H)          # (H, H)   MLP layer 2
    blk("wact", H)        # (H, A)   action head
    blk("w_r", 2 * H)     # (2H, H)  GRU reset gate   [Wih_r ; Whh_r]
    blk("w_z", 2 * H)     # (2H, H)  GRU update gate  [Wih_z ; Whh_z]
    blk("w_in", 2 * H)    # (2H, H)  GRU new gate, x part  [Wih_n ; 0]
    blk("w_hn", 2 * H)    # (2H, H)  GRU new gate, h part  [0 ; Whh_n]
    blk("vec", _N_VEC_ROWS)  # 1-D params: LN scales/biases + matmul biases
    off["rows"] = _r8(r)
    off["cols"] = cols
    return off


def pack_params(params, D, H, A):
    """Pack all Gate parameters into one (rows, cols) f32 slab (built once, offline)."""
    lay = _layout(D, H, A)
    P = np.zeros((lay["rows"], lay["cols"]), np.float32)

    def put(name, mat):
        mat = np.asarray(mat, np.float32)
        r, c = mat.shape
        P[lay[name]:lay[name] + r, :c] = mat

    put("w1", params["w1"])
    put("w2", params["w2"])
    put("wact", params["wact"])

    wih = np.asarray(params["wih"], np.float32)          # (H, 3H), gate order r,z,n
    whh = np.asarray(params["whh"], np.float32)          # (H, 3H)
    zH = np.zeros((H, H), np.float32)
    put("w_r", np.concatenate([wih[:, 0:H], whh[:, 0:H]], axis=0))
    put("w_z", np.concatenate([wih[:, H:2 * H], whh[:, H:2 * H]], axis=0))
    put("w_in", np.concatenate([wih[:, 2 * H:3 * H], zH], axis=0))
    put("w_hn", np.concatenate([zH, whh[:, 2 * H:3 * H]], axis=0))

    vec = np.zeros((_N_VEC_ROWS, lay["cols"]), np.float32)

    def putv(i, v):
        v = np.asarray(v, np.float32).reshape(-1)
        vec[i, :v.shape[0]] = v

    bih = np.asarray(params["bih"], np.float32).reshape(-1)   # (3H,)
    bhh = np.asarray(params["bhh"], np.float32).reshape(-1)   # (3H,)
    putv(_LN0W, params["ln0w"]); putv(_LN0B, params["ln0b"])
    putv(_B1, params["b1"]);     putv(_LN1W, params["ln1w"]); putv(_LN1B, params["ln1b"])
    putv(_B2, params["b2"]);     putv(_LN2W, params["ln2w"]); putv(_LN2B, params["ln2b"])
    putv(_BR, bih[0:H] + bhh[0:H])            # r gate: biases always appear summed
    putv(_BZ, bih[H:2 * H] + bhh[H:2 * H])    # z gate: biases always appear summed
    putv(_BIN, bih[2 * H:3 * H])              # n gate, x-path bias
    putv(_BHN, bhh[2 * H:3 * H])              # n gate, h-path bias (inside r*(...))
    putv(_LNRW, params["lnrw"]); putv(_LNRB, params["lnrb"])
    putv(_BACT, params["bact"])
    P[lay["vec"]:lay["vec"] + _N_VEC_ROWS, :] = vec
    return jnp.asarray(P)


def _make_kernel(D, H, A, lay, out_w):
    ov = lay["vec"]

    def vec_row(p_ref, idx, width):
        # (1, width) static slice at lane offset 0 -> broadcast over the batch rows.
        r = ov + idx
        return p_ref[r:r + 1, :width]

    def layernorm(x, p_ref, wrow, brow, width, eps=1e-5):
        mu = jnp.mean(x, axis=-1, keepdims=True)
        var = jnp.mean((x - mu) ** 2, axis=-1, keepdims=True)
        xn = (x - mu) * jax.lax.rsqrt(var + eps)
        return xn * vec_row(p_ref, wrow, width) + vec_row(p_ref, brow, width)

    def kernel(obs_ref, h0_ref, masks_ref, p_ref, out_ref):
        obs = obs_ref[...]                                      # (bt, D)

        # ---- MLPBase: feature LayerNorm + 2 x (Linear -> tanh -> LayerNorm) ----
        x = layernorm(obs, p_ref, _LN0W, _LN0B, D)
        w1 = p_ref[lay["w1"]:lay["w1"] + D, :H]
        x = jnp.tanh(jnp.dot(x, w1, preferred_element_type=jnp.float32)
                     + vec_row(p_ref, _B1, H))
        x = layernorm(x, p_ref, _LN1W, _LN1B, H)
        w2 = p_ref[lay["w2"]:lay["w2"] + H, :H]
        x = jnp.tanh(jnp.dot(x, w2, preferred_element_type=jnp.float32)
                     + vec_row(p_ref, _B2, H))
        x = layernorm(x, p_ref, _LN2W, _LN2B, H)                # (bt, H)

        # ---- RNNLayer: masked GRU cell (recurrent_N = 1) + output LayerNorm ----
        h_prev = h0_ref[...] * masks_ref[...]                   # (bt, H) * (bt, 1)
        xh = jnp.concatenate([x, h_prev], axis=-1)              # (bt, 2H) fused K

        def gate(name, brow):
            w = p_ref[lay[name]:lay[name] + 2 * H, :H]          # 8-aligned row block
            return (jnp.dot(xh, w, preferred_element_type=jnp.float32)
                    + vec_row(p_ref, brow, H))                  # (bt, H), no slicing

        r = jax.nn.sigmoid(gate("w_r", _BR))
        z = jax.nn.sigmoid(gate("w_z", _BZ))
        n = jnp.tanh(gate("w_in", _BIN) + r * gate("w_hn", _BHN))
        h_new = (1.0 - z) * n + z * h_prev                      # (bt, H)
        x_r = layernorm(h_new, p_ref, _LNRW, _LNRB, H)

        # ---- Gate.forward residual + ACTLayer (Discrete(A)) ----
        feat = x + x_r
        wact = p_ref[lay["wact"]:lay["wact"] + H, :A]
        logits = (jnp.dot(feat, wact, preferred_element_type=jnp.float32)
                  + vec_row(p_ref, _BACT, A))                   # (bt, A)

        m = jnp.max(logits, axis=-1, keepdims=True)
        lse = m + jnp.log(jnp.sum(jnp.exp(logits - m), axis=-1, keepdims=True))
        logp_max = m - lse                                      # log-prob of argmax
        act_f = jnp.argmax(logits, axis=-1)[:, None].astype(jnp.float32)

        # Single lane-dense (bt, out_w) output slab:
        #   lanes [0:H] = h_new, lane H = logp, lane H+1 = action (as f32).
        col = jax.lax.broadcasted_iota(jnp.int32, (obs.shape[0], out_w), 1)
        out_ref[...] = jnp.where(col == H, logp_max,
                                 jnp.where(col == H + 1, act_f, 0.0))
        out_ref[:, 0:H] = h_new                                 # ordered after full write

    return kernel


def gate_forward(obs, rnn_states, masks, packed_params, *, num_actions, block_b=256):
    """obs: (B, D) f32; rnn_states: (B, 1, H) f32; masks: (B, 1) f32."""
    B, D = obs.shape
    assert rnn_states.shape[1] == 1  # TODO(synk): recurrent_N > 1 not kernelized
    H = rnn_states.shape[-1]
    A = num_actions
    lay = _layout(D, H, A)
    assert packed_params.shape == (lay["rows"], lay["cols"])
    out_w = _r128(H + 2)             # lane-dense output slab width (>= 128)

    # Size-1-dim squeeze is a metadata-only reshape under jit (no HBM copy).
    h0 = rnn_states.reshape(B, H)

    # Batch tiling: single tile for small B; 256-row tiles (parallel grid -> both
    # TensorCores on v7x) for large rollout batches. Pad B if it doesn't divide.
    bt = B if B <= block_b else block_b
    Bp = pl.cdiv(B, bt) * bt
    if Bp != B:
        pad = Bp - B
        obs = jnp.pad(obs, ((0, pad), (0, 0)))
        h0 = jnp.pad(h0, ((0, pad), (0, 0)))
        masks = jnp.pad(masks, ((0, pad), (0, 0)))

    kernel = _make_kernel(D, H, A, lay, out_w)
    slab = pl.pallas_call(
        kernel,
        grid=(Bp // bt,),
        in_specs=[
            pl.BlockSpec((bt, D), lambda i: (i, 0)),
            pl.BlockSpec((bt, H), lambda i: (i, 0)),
            pl.BlockSpec((bt, 1), lambda i: (i, 0)),
            pl.BlockSpec((lay["rows"], lay["cols"]), lambda i: (0, 0)),  # param slab
        ],
        out_specs=pl.BlockSpec((bt, out_w), lambda i: (i, 0)),  # one lane-dense slab
        out_shape=jax.ShapeDtypeStruct((Bp, out_w), jnp.float32),
        compiler_params=pltpu.CompilerParams(dimension_semantics=("parallel",)),
    )(obs, h0, masks, packed_params)

    h_out = slab[:B, 0:H].reshape(B, 1, H)      # size-1-dim insert: metadata-only
    logp = slab[:B, H:H + 1]
    actions = slab[:B, H + 1:H + 2].astype(jnp.int32)
    return actions, logp, h_out


def init_params(key, D, H, A):
    ks = jax.random.split(key, 8)
    s = 0.1
    return {
        # MLPBase feature norm + 2 MLP layers (weights stored (in, out))
        "ln0w": jnp.ones((1, D), jnp.float32),
        "ln0b": jnp.zeros((1, D), jnp.float32),
        "w1": s * jax.random.normal(ks[0], (D, H), jnp.float32),
        "b1": jnp.zeros((1, H), jnp.float32),
        "ln1w": jnp.ones((1, H), jnp.float32),
        "ln1b": jnp.zeros((1, H), jnp.float32),
        "w2": s * jax.random.normal(ks[1], (H, H), jnp.float32),
        "b2": jnp.zeros((1, H), jnp.float32),
        "ln2w": jnp.ones((1, H), jnp.float32),
        "ln2b": jnp.zeros((1, H), jnp.float32),
        # GRU cell (PyTorch gate order r, z, n), stored transposed: (in, 3H)
        "wih": s * jax.random.normal(ks[2], (H, 3 * H), jnp.float32),
        "bih": s * jax.random.normal(ks[3], (1, 3 * H), jnp.float32),
        "whh": s * jax.random.normal(ks[4], (H, 3 * H), jnp.float32),
        "bhh": s * jax.random.normal(ks[5], (1, 3 * H), jnp.float32),
        "lnrw": jnp.ones((1, H), jnp.float32),
        "lnrb": jnp.zeros((1, H), jnp.float32),
        # ACTLayer linear -> A discrete logits
        "wact": s * jax.random.normal(ks[6], (H, A), jnp.float32),
        "bact": s * jax.random.normal(ks[7], (1, A), jnp.float32),
    }


def _layernorm_ref(x, w, b, eps=1e-5):
    mu = jnp.mean(x, axis=-1, keepdims=True)
    var = jnp.mean((x - mu) ** 2, axis=-1, keepdims=True)
    return (x - mu) * jax.lax.rsqrt(var + eps) * w + b


def gate_reference(obs, rnn_states, masks, params):
    """Pure-JAX reference of the same forward pass (for sanity checking)."""
    x = _layernorm_ref(obs, params["ln0w"], params["ln0b"])
    x = _layernorm_ref(jnp.tanh(x @ params["w1"] + params["b1"]),
                       params["ln1w"], params["ln1b"])
    x = _layernorm_ref(jnp.tanh(x @ params["w2"] + params["b2"]),
                       params["ln2w"], params["ln2b"])
    h_prev = rnn_states[:, 0, :] * masks
    gi = x @ params["wih"] + params["bih"]
    gh = h_prev @ params["whh"] + params["bhh"]
    H = h_prev.shape[-1]
    r = jax.nn.sigmoid(gi[:, :H] + gh[:, :H])
    z = jax.nn.sigmoid(gi[:, H:2 * H] + gh[:, H:2 * H])
    n = jnp.tanh(gi[:, 2 * H:] + r * gh[:, 2 * H:])
    h_new = (1.0 - z) * n + z * h_prev
    feat = x + _layernorm_ref(h_new, params["lnrw"], params["lnrb"])
    logits = feat @ params["wact"] + params["bact"]
    logp = jax.nn.log_softmax(logits, axis=-1)
    acts = jnp.argmax(logits, axis=-1)
    return (acts.astype(jnp.int32)[:, None],
            jnp.max(logp, axis=-1, keepdims=True),
            h_new[:, None, :])


if __name__ == "__main__":
    D, H, A = 24, 32, 8                      # obs_dim, hidden_size, Discrete(8)
    key = jax.random.PRNGKey(0)
    k_data, k_p = jax.random.split(key)

    params = init_params(k_p, D, H, A)
    packed = pack_params(params, D, H, A)    # one-time offline packing

    fwd = jax.jit(functools.partial(gate_forward, num_actions=A))

    def run_and_check(B, name):
        ko, kh = jax.random.split(jax.random.fold_in(k_data, B))
        obs = jax.random.normal(ko, (B, D), jnp.float32)
        rnn_states = jax.random.normal(kh, (B, 1, H), jnp.float32)
        masks = jnp.ones((B, 1), jnp.float32).at[0, 0].set(0.0)   # one env reset

        actions, logp, h_out = fwd(obs, rnn_states, masks, packed)
        jax.block_until_ready((actions, logp, h_out))

        ref_a, ref_lp, ref_h = gate_reference(obs, rnn_states, masks, params)
        assert jnp.allclose(logp, ref_lp, atol=1e-4, rtol=1e-4), name
        assert jnp.allclose(h_out, ref_h, atol=1e-4, rtol=1e-4), name
        match = float(jnp.mean((actions == ref_a).astype(jnp.float32)))
        assert match >= 0.98, (name, match)   # tolerate numerical near-tie argmax flips

    run_and_check(8, "small batch (single tile)")
    run_and_check(512, "large batch (batch grid, parallel dim)")
    print("KERNEL_OK")
</pallas_src>

<mosaic_0001>
module attributes {stable_mosaic.version = 11 : i64} {
  func.func @kernel(%arg0: i32, %arg1: memref<8x24xf32, #tpu.memory_space<vmem>>, %arg2: memref<8x32xf32, #tpu.memory_space<vmem>>, %arg3: memref<8x1xf32, #tpu.memory_space<vmem>>, %arg4: memref<360x32xf32, #tpu.memory_space<vmem>>, %arg5: memref<8x128xf32, #tpu.memory_space<vmem>>) attributes {dimension_semantics = [#tpu.dimension_semantics<parallel>], iteration_bounds = array<i64: 1>, scalar_prefetch = 0 : i64, scratch_operands = 0 : i64, tpu.core_type = #tpu.core_type<tc>, window_params = [{transform_indices = @transform_0, window_bounds = array<i64: 8, 24>}, {transform_indices = @transform_1, window_bounds = array<i64: 8, 32>}, {transform_indices = @transform_2, window_bounds = array<i64: 8, 1>}, {pipeline_mode = #tpu.pipeline_mode<synchronous>, transform_indices = @transform_3, window_bounds = array<i64: 360, 32>}, {transform_indices = @transform_4, window_bounds = array<i64: 8, 128>}]} {
    %c0 = arith.constant 0 : index
    %c0_0 = arith.constant 0 : index
    %0 = vector.load %arg1[%c0, %c0_0] : memref<8x24xf32, #tpu.memory_space<vmem>>, vector<8x24xf32>
    %cst = arith.constant dense<0.000000e+00> : vector<8xf32>
    %1 = vector.multi_reduction <add>, %0, %cst [1] : vector<8x24xf32> to vector<8xf32>
    %2 = vector.shape_cast %1 : vector<8xf32> to vector<8x1xf32>
    %cst_1 = arith.constant 2.400000e+01 : f32
    %3 = vector.broadcast %cst_1 : f32 to vector<8x1xf32>
    %4 = arith.divf %2, %3 : vector<8x1xf32>
    %5 = vector.broadcast %4 : vector<8x1xf32> to vector<8x24xf32>
    %6 = arith.subf %0, %5 : vector<8x24xf32>
    %7 = arith.mulf %6, %6 : vector<8x24xf32>
    %cst_2 = arith.constant dense<0.000000e+00> : vector<8xf32>
    %8 = vector.multi_reduction <add>, %7, %cst_2 [1] : vector<8x24xf32> to vector<8xf32>
    %9 = vector.shape_cast %8 : vector<8xf32> to vector<8x1xf32>
    %cst_3 = arith.constant 2.400000e+01 : f32
    %10 = vector.broadcast %cst_3 : f32 to vector<8x1xf32>
    %11 = arith.divf %9, %10 : vector<8x1xf32>
    %12 = vector.broadcast %4 : vector<8x1xf32> to vector<8x24xf32>
    %13 = arith.subf %0, %12 : vector<8x24xf32>
    %cst_4 = arith.constant 9.99999974E-6 : f32
    %14 = vector.broadcast %cst_4 : f32 to vector<8x1xf32>
    %15 = arith.addf %11, %14 : vector<8x1xf32>
    %16 = math.rsqrt %15 : vector<8x1xf32>
    %17 = vector.broadcast %16 : vector<8x1xf32> to vector<8x24xf32>
    %18 = arith.mulf %13, %17 : vector<8x24xf32>
    %c344 = arith.constant 344 : index
    %c0_5 = arith.constant 0 : index
    %19 = vector.load %arg4[%c344, %c0_5] : memref<360x32xf32, #tpu.memory_space<vmem>>, vector<1x24xf32>
    %20 = vector.broadcast %19 : vector<1x24xf32> to vector<8x24xf32>
    %21 = arith.mulf %18, %20 : vector<8x24xf32>
    %c345 = arith.constant 345 : index
    %c0_6 = arith.constant 0 : index
    %22 = vector.load %arg4[%c345, %c0_6] : memref<360x32xf32, #tpu.memory_space<vmem>>, vector<1x24xf32>
    %23 = vector.broadcast %22 : vector<1x24xf32> to vector<8x24xf32>
    %24 = arith.addf %21, %23 : vector<8x24xf32>
    %c0_7 = arith.constant 0 : index
    %c0_8 = arith.constant 0 : index
    %25 = vector.load %arg4[%c0_7, %c0_8] : memref<360x32xf32, #tpu.memory_space<vmem>>, vector<24x32xf32>
    %cst_9 = arith.constant dense<0.000000e+00> : vector<8x32xf32>
    %26 = tpu.matmul %24, %25, %cst_9 {dimension_numbers = #tpu.dot_dimension_numbers<[1], [0], [0], [1], [0, 0, 1, 1], [], []>} : vector<8x24xf32>, vector<24x32xf32>, vector<8x32xf32> -> vector<8x32xf32>
    %c346 = arith.constant 346 : index
    %c0_10 = arith.constant 0 : index
    %27 = vector.load %arg4[%c346, %c0_10] : memref<360x32xf32, #tpu.memory_space<vmem>>, vector<1x32xf32>
    %28 = vector.broadcast %27 : vector<1x32xf32> to vector<8x32xf32>
    %29 = arith.addf %26, %28 : vector<8x32xf32>
    %30 = math.tanh %29 : vector<8x32xf32>
    %cst_11 = arith.constant dense<0.000000e+00> : vector<8xf32>
    %31 = vector.multi_reduction <add>, %30, %cst_11 [1] : vector<8x32xf32> to vector<8xf32>
    %32 = vector.shape_cast %31 : vector<8xf32> to vector<8x1xf32>
    %cst_12 = arith.constant 3.200000e+01 : f32
    %33 = vector.broadcast %cst_12 : f32 to vector<8x1xf32>
    %34 = arith.divf %32, %33 : vector<8x1xf32>
    %35 = vector.broadcast %34 : vector<8x1xf32> to vector<8x32xf32>
    %36 = arith.subf %30, %35 : vector<8x32xf32>
    %37 = arith.mulf %36, %36 : vector<8x32xf32>
    %cst_13 = arith.constant dense<0.000000e+00> : vector<8xf32>
    %38 = vector.multi_reduction <add>, %37, %cst_13 [1] : vector<8x32xf32> to vector<8xf32>
    %39 = vector.shape_cast %38 : vector<8xf32> to vector<8x1xf32>
    %cst_14 = arith.constant 3.200000e+01 : f32
    %40 = vector.broadcast %cst_14 : f32 to vector<8x1xf32>
    %41 = arith.divf %39, %40 : vector<8x1xf32>
    %42 = vector.broadcast %34 : vector<8x1xf32> to vector<8x32xf32>
    %43 = arith.subf %30, %42 : vector<8x32xf32>
    %cst_15 = arith.constant 9.99999974E-6 : f32
    %44 = vector.broadcast %cst_15 : f32 to vector<8x1xf32>
    %45 = arith.addf %41, %44 : vector<8x1xf32>
    %46 = math.rsqrt %45 : vector<8x1xf32>
    %47 = vector.broadcast %46 : vector<8x1xf32> to vector<8x32xf32>
    %48 = arith.mulf %43, %47 : vector<8x32xf32>
    %c347 = arith.constant 347 : index
    %c0_16 = arith.constant 0 : index
    %49 = vector.load %arg4[%c347, %c0_16] : memref<360x32xf32, #tpu.memory_space<vmem>>, vector<1x32xf32>
    %50 = vector.broadcast %49 : vector<1x32xf32> to vector<8x32xf32>
    %51 = arith.mulf %48, %50 : vector<8x32xf32>
    %c348 = arith.constant 348 : index
    %c0_17 = arith.constant 0 : index
    %52 = vector.load %arg4[%c348, %c0_17] : memref<360x32xf32, #tpu.memory_space<vmem>>, vector<1x32xf32>
    %53 = vector.broadcast %52 : vector<1x32xf32> to vector<8x32xf32>
    %54 = arith.addf %51, %53 : vector<8x32xf32>
    %c24 = arith.constant 24 : index
    %c0_18 = arith.constant 0 : index
    %55 = vector.load %arg4[%c24, %c0_18] : memref<360x32xf32, #tpu.memory_space<vmem>>, vector<32x32xf32>
    %cst_19 = arith.constant dense<0.000000e+00> : vector<8x32xf32>
    %56 = tpu.matmul %54, %55, %cst_19 {dimension_numbers = #tpu.dot_dimension_numbers<[1], [0], [0], [1], [0, 0, 1, 1], [], []>} : vector<8x32xf32>, vector<32x32xf32>, vector<8x32xf32> -> vector<8x32xf32>
    %c349 = arith.constant 349 : index
    %c0_20 = arith.constant 0 : index
    %57 = vector.load %arg4[%c349, %c0_20] : memref<360x32xf32, #tpu.memory_space<vmem>>, vector<1x32xf32>
    %58 = vector.broadcast %57 : vector<1x32xf32> to vector<8x32xf32>
    %59 = arith.addf %56, %58 : vector<8x32xf32>
    %60 = math.tanh %59 : vector<8x32xf32>
    %cst_21 = arith.constant dense<0.000000e+00> : vector<8xf32>
    %61 = vector.multi_reduction <add>, %60, %cst_21 [1] : vector<8x32xf32> to vector<8xf32>
    %62 = vector.shape_cast %61 : vector<8xf32> to vector<8x1xf32>
    %cst_22 = arith.constant 3.200000e+01 : f32
    %63 = vector.broadcast %cst_22 : f32 to vector<8x1xf32>
    %64 = arith.divf %62, %63 : vector<8x1xf32>
    %65 = vector.broadcast %64 : vector<8x1xf32> to vector<8x32xf32>
    %66 = arith.subf %60, %65 : vector<8x32xf32>
    %67 = arith.mulf %66, %66 : vector<8x32xf32>
    %cst_23 = arith.constant dense<0.000000e+00> : vector<8xf32>
    %68 = vector.multi_reduction <add>, %67, %cst_23 [1] : vector<8x32xf32> to vector<8xf32>
    %69 = vector.shape_cast %68 : vector<8xf32> to vector<8x1xf32>
    %cst_24 = arith.constant 3.200000e+01 : f32
    %70 = vector.broadcast %cst_24 : f32 to vector<8x1xf32>
    %71 = arith.divf %69, %70 : vector<8x1xf32>
    %72 = vector.broadcast %64 : vector<8x1xf32> to vector<8x32xf32>
    %73 = arith.subf %60, %72 : vector<8x32xf32>
    %cst_25 = arith.constant 9.99999974E-6 : f32
    %74 = vector.broadcast %cst_25 : f32 to vector<8x1xf32>
    %75 = arith.addf %71, %74 : vector<8x1xf32>
    %76 = math.rsqrt %75 : vector<8x1xf32>
    %77 = vector.broadcast %76 : vector<8x1xf32> to vector<8x32xf32>
    %78 = arith.mulf %73, %77 : vector<8x32xf32>
    %c350 = arith.constant 350 : index
    %c0_26 = arith.constant 0 : index
    %79 = vector.load %arg4[%c350, %c0_26] : memref<360x32xf32, #tpu.memory_space<vmem>>, vector<1x32xf32>
    %80 = vector.broadcast %79 : vector<1x32xf32> to vector<8x32xf32>
    %81 = arith.mulf %78, %80 : vector<8x32xf32>
    %c351 = arith.constant 351 : index
    %c0_27 = arith.constant 0 : index
    %82 = vector.load %arg4[%c351, %c0_27] : memref<360x32xf32, #tpu.memory_space<vmem>>, vector<1x32xf32>
    %83 = vector.broadcast %82 : vector<1x32xf32> to vector<8x32xf32>
    %84 = arith.addf %81, %83 : vector<8x32xf32>
    %c0_28 = arith.constant 0 : index
    %c0_29 = arith.constant 0 : index
    %85 = vector.load %arg2[%c0_28, %c0_29] : memref<8x32xf32, #tpu.memory_space<vmem>>, vector<8x32xf32>
    %c0_30 = arith.constant 0 : index
    %c0_31 = arith.constant 0 : index
    %86 = vector.load %arg3[%c0_30, %c0_31] : memref<8x1xf32, #tpu.memory_space<vmem>>, vector<8x1xf32>
    %87 = vector.broadcast %86 : vector<8x1xf32> to vector<8x32xf32>
    %88 = arith.mulf %85, %87 : vector<8x32xf32>
    %89 = tpu.concatenate %84, %88 in 1 : vector<8x32xf32>, vector<8x32xf32> -> vector<8x64xf32>
    %c88 = arith.constant 88 : index
    %c0_32 = arith.constant 0 : index
    %90 = vector.load %arg4[%c88, %c0_32] : memref<360x32xf32, #tpu.memory_space<vmem>>, vector<64x32xf32>
    %cst_33 = arith.constant dense<0.000000e+00> : vector<8x32xf32>
    %91 = tpu.matmul %89, %90, %cst_33 {dimension_numbers = #tpu.dot_dimension_numbers<[1], [0], [0], [1], [0, 0, 1, 1], [], []>} : vector<8x64xf32>, vector<64x32xf32>, vector<8x32xf32> -> vector<8x32xf32>
    %c352 = arith.constant 352 : index
    %c0_34 = arith.constant 0 : index
    %92 = vector.load %arg4[%c352, %c0_34] : memref<360x32xf32, #tpu.memory_space<vmem>>, vector<1x32xf32>
    %93 = vector.broadcast %92 : vector<1x32xf32> to vector<8x32xf32>
    %94 = arith.addf %91, %93 : vector<8x32xf32>
    %95 = arith.negf %94 : vector<8x32xf32>
    %96 = math.exp %95 : vector<8x32xf32>
    %cst_35 = arith.constant 1.000000e+00 : f32
    %97 = vector.broadcast %cst_35 : f32 to vector<8x32xf32>
    %98 = arith.addf %97, %96 : vector<8x32xf32>
    %99 = arith.divf %97, %98 : vector<8x32xf32>
    %c152 = arith.constant 152 : index
    %c0_36 = arith.constant 0 : index
    %100 = vector.load %arg4[%c152, %c0_36] : memref<360x32xf32, #tpu.memory_space<vmem>>, vector<64x32xf32>
    %cst_37 = arith.constant dense<0.000000e+00> : vector<8x32xf32>
    %101 = tpu.matmul %89, %100, %cst_37 {dimension_numbers = #tpu.dot_dimension_numbers<[1], [0], [0], [1], [0, 0, 1, 1], [], []>} : vector<8x64xf32>, vector<64x32xf32>, vector<8x32xf32> -> vector<8x32xf32>
    %c353 = arith.constant 353 : index
    %c0_38 = arith.constant 0 : index
    %102 = vector.load %arg4[%c353, %c0_38] : memref<360x32xf32, #tpu.memory_space<vmem>>, vector<1x32xf32>
    %103 = vector.broadcast %102 : vector<1x32xf32> to vector<8x32xf32>
    %104 = arith.addf %101, %103 : vector<8x32xf32>
    %105 = arith.negf %104 : vector<8x32xf32>
    %106 = math.exp %105 : vector<8x32xf32>
    %cst_39 = arith.constant 1.000000e+00 : f32
    %107 = vector.broadcast %cst_39 : f32 to vector<8x32xf32>
    %108 = arith.addf %107, %106 : vector<8x32xf32>
    %109 = arith.divf %107, %108 : vector<8x32xf32>
    %c216 = arith.constant 216 : index
    %c0_40 = arith.constant 0 : index
    %110 = vector.load %arg4[%c216, %c0_40] : memref<360x32xf32, #tpu.memory_space<vmem>>, vector<64x32xf32>
    %cst_41 = arith.constant dense<0.000000e+00> : vector<8x32xf32>
    %111 = tpu.matmul %89, %110, %cst_41 {dimension_numbers = #tpu.dot_dimension_numbers<[1], [0], [0], [1], [0, 0, 1, 1], [], []>} : vector<8x64xf32>, vector<64x32xf32>, vector<8x32xf32> -> vector<8x32xf32>
    %c354 = arith.constant 354 : index
    %c0_42 = arith.constant 0 : index
    %112 = vector.load %arg4[%c354, %c0_42] : memref<360x32xf32, #tpu.memory_space<vmem>>, vector<1x32xf32>
    %113 = vector.broadcast %112 : vector<1x32xf32> to vector<8x32xf32>
    %114 = arith.addf %111, %113 : vector<8x32xf32>
    %c280 = arith.constant 280 : index
    %c0_43 = arith.constant 0 : index
    %115 = vector.load %arg4[%c280, %c0_43] : memref<360x32xf32, #tpu.memory_space<vmem>>, vector<64x32xf32>
    %cst_44 = arith.constant dense<0.000000e+00> : vector<8x32xf32>
    %116 = tpu.matmul %89, %115, %cst_44 {dimension_numbers = #tpu.dot_dimension_numbers<[1], [0], [0], [1], [0, 0, 1, 1], [], []>} : vector<8x64xf32>, vector<64x32xf32>, vector<8x32xf32> -> vector<8x32xf32>
    %c355 = arith.constant 355 : index
    %c0_45 = arith.constant 0 : index
    %117 = vector.load %arg4[%c355, %c0_45] : memref<360x32xf32, #tpu.memory_space<vmem>>, vector<1x32xf32>
    %118 = vector.broadcast %117 : vector<1x32xf32> to vector<8x32xf32>
    %119 = arith.addf %116, %118 : vector<8x32xf32>
    %120 = arith.mulf %99, %119 : vector<8x32xf32>
    %121 = arith.addf %114, %120 : vector<8x32xf32>
    %122 = math.tanh %121 : vector<8x32xf32>
    %cst_46 = arith.constant 1.000000e+00 : f32
    %123 = vector.broadcast %cst_46 : f32 to vector<8x32xf32>
    %124 = arith.subf %123, %109 : vector<8x32xf32>
    %125 = arith.mulf %124, %122 : vector<8x32xf32>
    %126 = arith.mulf %109, %88 : vector<8x32xf32>
    %127 = arith.addf %125, %126 : vector<8x32xf32>
    %cst_47 = arith.constant dense<0.000000e+00> : vector<8xf32>
    %128 = vector.multi_reduction <add>, %127, %cst_47 [1] : vector<8x32xf32> to vector<8xf32>
    %129 = vector.shape_cast %128 : vector<8xf32> to vector<8x1xf32>
    %cst_48 = arith.constant 3.200000e+01 : f32
    %130 = vector.broadcast %cst_48 : f32 to vector<8x1xf32>
    %131 = arith.divf %129, %130 : vector<8x1xf32>
    %132 = vector.broadcast %131 : vector<8x1xf32> to vector<8x32xf32>
    %133 = arith.subf %127, %132 : vector<8x32xf32>
    %134 = arith.mulf %133, %133 : vector<8x32xf32>
    %cst_49 = arith.constant dense<0.000000e+00> : vector<8xf32>
    %135 = vector.multi_reduction <add>, %134, %cst_49 [1] : vector<8x32xf32> to vector<8xf32>
    %136 = vector.shape_cast %135 : vector<8xf32> to vector<8x1xf32>
    %cst_50 = arith.constant 3.200000e+01 : f32
    %137 = vector.broadcast %cst_50 : f32 to vector<8x1xf32>
    %138 = arith.divf %136, %137 : vector<8x1xf32>
    %139 = vector.broadcast %131 : vector<8x1xf32> to vector<8x32xf32>
    %140 = arith.subf %127, %139 : vector<8x32xf32>
    %cst_51 = arith.constant 9.99999974E-6 : f32
    %141 = vector.broadcast %cst_51 : f32 to vector<8x1xf32>
    %142 = arith.addf %138, %141 : vector<8x1xf32>
    %143 = math.rsqrt %142 : vector<8x1xf32>
    %144 = vector.broadcast %143 : vector<8x1xf32> to vector<8x32xf32>
    %145 = arith.mulf %140, %144 : vector<8x32xf32>
    %c356 = arith.constant 356 : index
    %c0_52 = arith.constant 0 : index
    %146 = vector.load %arg4[%c356, %c0_52] : memref<360x32xf32, #tpu.memory_space<vmem>>, vector<1x32xf32>
    %147 = vector.broadcast %146 : vector<1x32xf32> to vector<8x32xf32>
    %148 = arith.mulf %145, %147 : vector<8x32xf32>
    %c357 = arith.constant 357 : index
    %c0_53 = arith.constant 0 : index
    %149 = vector.load %arg4[%c357, %c0_53] : memref<360x32xf32, #tpu.memory_space<vmem>>, vector<1x32xf32>
    %150 = vector.broadcast %149 : vector<1x32xf32> to vector<8x32xf32>
    %151 = arith.addf %148, %150 : vector<8x32xf32>
    %152 = arith.addf %84, %151 : vector<8x32xf32>
    %c56 = arith.constant 56 : index
    %c0_54 = arith.constant 0 : index
    %153 = vector.load %arg4[%c56, %c0_54] : memref<360x32xf32, #tpu.memory_space<vmem>>, vector<32x8xf32>
    %cst_55 = arith.constant dense<0.000000e+00> : vector<8x8xf32>
    %154 = tpu.matmul %152, %153, %cst_55 {dimension_numbers = #tpu.dot_dimension_numbers<[1], [0], [0], [1], [0, 0, 1, 1], [], []>} : vector<8x32xf32>, vector<32x8xf32>, vector<8x8xf32> -> vector<8x8xf32>
    %c358 = arith.constant 358 : index
    %c0_56 = arith.constant 0 : index
    %155 = vector.load %arg4[%c358, %c0_56] : memref<360x32xf32, #tpu.memory_space<vmem>>, vector<1x8xf32>
    %156 = vector.broadcast %155 : vector<1x8xf32> to vector<8x8xf32>
    %157 = arith.addf %154, %156 : vector<8x8xf32>
    %cst_57 = arith.constant dense<0xFF800000> : vector<8xf32>
    %158 = vector.multi_reduction <maximumf>, %157, %cst_57 [1] : vector<8x8xf32> to vector<8xf32>
    %159 = vector.shape_cast %158 : vector<8xf32> to vector<8x1xf32>
    %160 = vector.broadcast %159 : vector<8x1xf32> to vector<8x8xf32>
    %161 = arith.subf %157, %160 : vector<8x8xf32>
    %162 = math.exp %161 : vector<8x8xf32>
    %cst_58 = arith.constant dense<0.000000e+00> : vector<8xf32>
    %163 = vector.multi_reduction <add>, %162, %cst_58 [1] : vector<8x8xf32> to vector<8xf32>
    %164 = vector.shape_cast %163 : vector<8xf32> to vector<8x1xf32>
    %165 = math.log %164 : vector<8x1xf32>
    %166 = arith.addf %159, %165 : vector<8x1xf32>
    %167 = arith.subf %159, %166 : vector<8x1xf32>
    %168 = tpu.reduce_index %157 {axis = 1 : i32, kind = #tpu.reduction_kind<arg_max>} : vector<8x8xf32> -> vector<8xi32>
    %169 = vector.shape_cast %168 : vector<8xi32> to vector<8x1xi32>
    %170 = arith.sitofp %169 : vector<8x1xi32> to vector<8x1xf32>
    %171 = tpu.iota {dimensions = array<i32: 1>} : vector<8x128xi32>
    %c32_i32 = arith.constant 32 : i32
    %172 = vector.broadcast %c32_i32 : i32 to vector<8x128xi32>
    %173 = arith.cmpi eq, %171, %172 : vector<8x128xi32>
    %c33_i32 = arith.constant 33 : i32
    %174 = vector.broadcast %c33_i32 : i32 to vector<8x128xi32>
    %175 = arith.cmpi eq, %171, %174 : vector<8x128xi32>
    %cst_59 = arith.constant 0.000000e+00 : f32
    %176 = vector.shape_cast %170 : vector<8x1xf32> to vector<8x1xf32>
    %177 = vector.broadcast %176 : vector<8x1xf32> to vector<8x128xf32>
    %178 = vector.broadcast %cst_59 : f32 to vector<8x128xf32>
    %179 = arith.select %175, %177, %178 : vector<8x128xi1>, vector<8x128xf32>
    %180 = vector.shape_cast %167 : vector<8x1xf32> to vector<8x1xf32>
    %181 = vector.broadcast %180 : vector<8x1xf32> to vector<8x128xf32>
    %182 = arith.select %173, %181, %179 : vector<8x128xi1>, vector<8x128xf32>
    %c0_60 = arith.constant 0 : index
    %c0_61 = arith.constant 0 : index
    %183 = vector.load %arg5[%c0_60, %c0_61] : memref<8x128xf32, #tpu.memory_space<vmem>>, vector<8x128xf32>
    tpu.vector_store %arg5[%c0_60, %c0_61], %182 {strides = array<i32>} : memref<8x128xf32, #tpu.memory_space<vmem>>, vector<8x128xf32>,
    %c0_62 = arith.constant 0 : index
    %c0_63 = arith.constant 0 : index
    %184 = vector.load %arg5[%c0_62, %c0_63] : memref<8x128xf32, #tpu.memory_space<vmem>>, vector<8x32xf32>
    tpu.vector_store %arg5[%c0_62, %c0_63], %127 {strides = array<i32>} : memref<8x128xf32, #tpu.memory_space<vmem>>, vector<8x32xf32>,
    return
  }
  func.func @transform_0(%arg0: i32) -> (i32, i32) {
    %c0_i32 = arith.constant 0 : i32
    %c0_i32_0 = arith.constant 0 : i32
    return %arg0, %c0_i32 : i32, i32
  }
  func.func @transform_1(%arg0: i32) -> (i32, i32) {
    %c0_i32 = arith.constant 0 : i32
    %c0_i32_0 = arith.constant 0 : i32
    return %arg0, %c0_i32 : i32, i32
  }
  func.func @transform_2(%arg0: i32) -> (i32, i32) {
    %c0_i32 = arith.constant 0 : i32
    %c0_i32_0 = arith.constant 0 : i32
    return %arg0, %c0_i32 : i32, i32
  }
  func.func @transform_3(%arg0: i32) -> (i32, i32) {
    %c0_i32 = arith.constant 0 : i32
    %c0_i32_0 = arith.constant 0 : i32
    %c0_i32_1 = arith.constant 0 : i32
    return %c0_i32, %c0_i32_0 : i32, i32
  }
  func.func @transform_4(%arg0: i32) -> (i32, i32) {
    %c0_i32 = arith.constant 0 : i32
    %c0_i32_0 = arith.constant 0 : i32
    return %arg0, %c0_i32 : i32, i32
  }
}

</mosaic_0001>

<bundles_post_ra>
// kernel: gate_forward.1
= control target key start
LH: loop header
LB: loop body
LE: loop exit
PB: predicated region body
PF: predicated region fallthrough
CT: control target
= control target key end

     0   :  { %vm18_vm0 = vcmask 195584   ;;  %v980_v7 = vmov 0.0   ;;  %vm981_vm1 = vmmov 0   ;;  %vm127_vm2 = vcmask 261120   ;;  %s983_s11 = smov 32   ;;  %s1290_s0 = inlined_call_operand.vmem [shape: f32[8,24], index: 0, kind: input, shape index: {}]   ;;  %s1291_s3 = inlined_call_operand.vmem [shape: f32[360,32], index: 3, kind: input, shape index: {}]   ;;  %s1292_s2 = inlined_call_operand.vmem [shape: f32[8,1], index: 2, kind: input, shape index: {}]   ;;  %s1293_s1 = inlined_call_operand.vmem [shape: f32[8,32], index: 1, kind: input, shape index: {}]   ;;  %s1294_s4 = inlined_call_operand.vmem [shape: f32[8,128], index: 4, kind: output, shape index: {}]  }
   0x1   :  { %v17_v0 = vld [vmem:[%s1290_s0] sm:$0xff]  ;;  %841 = vmatprep.subr.mxu0 %v980_v7  ;;  %v47_v8 = vld [vmem:[%s1291_s3 + $0x10] sm:$0xff]  ;;  %v46_v9 = vld [vmem:[%s1291_s3 + $0x8] sm:$0xff]  ;;  %847 = vmatprep.mubr.msk.f32.mxu0 %vm981_vm1, %v980_v7  ;;  %v982_v44 = vmov 0   ;;  %vm288_vm3 = vcmask 523264   ;;  %vm738_vm4 = vcmask 64512  }
   0x2   :  { %v19_v1 = vsel %vm18_vm0, %v17_v0, 0.0  ;;  %842 = vmatpush3.msra.mxu0 %v47_v8  ;;  %850 = vmatprep.subr.mxu1 %v980_v7  ;;  %v45_v10 = vld [vmem:[%s1291_s3] sm:$0xff]  ;;  %v767_v15 = vld [vmem:[%s1291_s3 + $0x158] ss:$0 sm:$0xff]  ;;  %v768_v17 = vld [vmem:[%s1291_s3 + $0x159] ss:$0 sm:$0xff] }
   0x3   :  { %20 = vadd.xlane.f32.xlu0 %v19_v1  ;;  %843 = vmatprep.subr.mxu0 %v980_v7  ;;  %v769_v20 = vld [vmem:[%s1291_s3 + $0x15a] ss:$0 sm:$0xff]  ;;  %v157_v31 = vld [vmem:[%s1291_s3 + $0x30] sm:$0xff]  ;;  %v156_v32 = vld [vmem:[%s1291_s3 + $0x28] sm:$0xff] }
   0x4   :  { %858 = vmatprep.mubr.msk.f32.mxu1 %vm981_vm1, %v980_v7  ;;  %844 = vmatpush3.msra.mxu0 %v46_v9  ;;  %v155_v33 = vld [vmem:[%s1291_s3 + $0x20] sm:$0xff]  ;;  %v154_v34 = vld [vmem:[%s1291_s3 + $0x18] sm:$0xff]  ;;  %v282_v57 = vld [vmem:[%s1291_s3 + $0x90] sm:$0xff] }
   0x5   :  { %845 = vmatprep.subr.mxu0 %v980_v7  ;;  %851 = vmatpush3.msra.mxu1 %v157_v31  ;;  %v771_v39 = vld [vmem:[%s1291_s3 + $0x15b] ss:$0 sm:$0xff]  ;;  %v772_v41 = vld [vmem:[%s1291_s3 + $0x15c] ss:$0 sm:$0xff]  ;;  %v263_v45 = vld [vmem:[%s1292_s2] sm:$0xff] }
   0x6   :  { %846 = vmatpush3.msra.mxu0 %v45_v10  ;;  %852 = vmatprep.subr.mxu1 %v980_v7  ;;  %v773_v46 = vld [vmem:[%s1291_s3 + $0x15d] ss:$0 sm:$0xff]  ;;  %v375_v58 = vld [vmem:[%s1291_s3 + $0xd0] sm:$0xff]  ;;  %v281_v59 = vld [vmem:[%s1291_s3 + $0x88] sm:$0xff] }
   0x7   :  { %861 = vmatprep.subr.mxu0 %v980_v7  ;;  %853 = vmatpush3.msra.mxu1 %v156_v32  ;;  %v262_v60 = vld [vmem:[%s1293_s1] sm:$0xff]  ;;  %v374_v62 = vld [vmem:[%s1291_s3 + $0xc8] sm:$0xff]  ;;  %v544_v31 = vld [vmem:[%s1291_s3 + $0x138] sm:$0xff] }
   0x8   :  { %854 = vmatprep.subr.mxu1 %v980_v7  ;;  %952 = vset.pattern.permute.xlu1 %v982_v44  ;;  %v280_v63 = vld [vmem:[%s1291_s3 + $0x80] sm:$0xff]  ;;  %v370_v8 = vld [vmem:[%s1291_s3 + $0xa8] sm:$0xff]  ;;  %v460_v32 = vld [vmem:[%s1291_s3 + $0xf0] sm:$0xff] }
   0x9   :  { %855 = vmatpush3.msra.mxu1 %v155_v33  ;;  %953 = vset.pattern.permute.xlu0 %v982_v44  ;;  %v276_v9 = vld [vmem:[%s1291_s3 + $0x60] sm:$0xff]  ;;  %v543_v33 = vld [vmem:[%s1291_s3 + $0x130] sm:$0xff] }
   0xa   :  { %856 = vmatprep.subr.mxu1 %v980_v7  ;;  %v369_v10 = vld [vmem:[%s1291_s3 + $0xa0] sm:$0xff] }
   0xb   :  { %857 = vmatpush3.msra.mxu1 %v154_v34  ;;  %v459_v34 = vld [vmem:[%s1291_s3 + $0xe8] sm:$0xff] }
   0xc   :  { %880 = vmatprep.subr.mxu1 %v980_v7 }
  0x8c   :  { %v21_v2 = vpop.xlane.xlu0 %20 }
  0x8d   :  { %v23_v3 = vmul.f32 0.041666668, %v21_v2  ;;  %v279_v2 = vld [vmem:[%s1291_s3 + $0x78] sm:$0xff] }
  0x8f   :  { %v24_v4 = vsub.f32 %v17_v0, %v23_v3  ;;  %v373_v0 = vld [vmem:[%s1291_s3 + $0xc0] sm:$0xff]  ;;  %v372_v3 = vld [vmem:[%s1291_s3 + $0xb8] sm:$0xff] }
  0x91   :  { %v25_v5 = vmul.f32 %v24_v4, %v24_v4 }
  0x93   :  { %v26_v6 = vsel %vm18_vm0, %v25_v5, 0.0  ;;  %v371_v5 = vld [vmem:[%s1291_s3 + $0xb0] sm:$0xff] }
  0x94   :  { %27 = vadd.xlane.f32.xlu0 %v26_v6  ;;  %v277_v6 = vld [vmem:[%s1291_s3 + $0x68] sm:$0xff] }
 0x11d   :  { %v28_v11 = vpop.xlane.xlu0 %27 }
 0x11e   :  { %v29_v12 = vmul.f32 0.041666668, %v28_v11  ;;  %v275_v11 = vld [vmem:[%s1291_s3 + $0x58] sm:$0xff] }
 0x120   :  { %v30_v13 = vadd.f32 1e-05, %v29_v12  ;;  %v368_v12 = vld [vmem:[%s1291_s3 + $0x98] sm:$0xff] }
 0x122   :  { %954 = vrsqrt.f32 %v30_v13 }
 0x12f   :  { %v955_v14 = vpop.eup %954 }
 0x130   :  { %v32_v16 = vmul.f32 %v955_v14, %v24_v4  ;;  %v278_v4 = vld [vmem:[%s1291_s3 + $0x70] sm:$0xff] }
 0x132   :  { %v38_v18 = vmul.f32 %v767_v15, %v32_v16 }
 0x134   :  { %v44_v19 = vadd.f32 %v768_v17, %v38_v18  ;;  %v775_v17 = vld [vmem:[%s1291_s3 + $0x15e] ss:$0 sm:$0xff] }
 0x136   :  { %848 = vmatmul.mubr.msk.f32.vlgmr.msra.gmra.mxu0 %vm18_vm0, %v44_v19  ;;  %v776_v19 = vld [vmem:[%s1291_s3 + $0x15f] ss:$0 sm:$0xff] }
 0x137   :  { %877 = vmatprep.mubr.msk.f32.mxu0 %vm981_vm1, %v980_v7  ;;  %862 = vmatpush3.msra.mxu0 %v282_v57  ;;  %v785_v57 = vld [vmem:[%s1291_s3 + $0x163] ss:$0 sm:$0xff] }
 0x138   :  { %863 = vmatprep.subr.mxu0 %v980_v7 }
 0x139   :  { %864 = vmatpush3.msra.mxu0 %v281_v59  ;;  %v783_v59 = vld [vmem:[%s1291_s3 + $0x162] ss:$0 sm:$0xff] }
 0x13a   :  { %865 = vmatprep.subr.mxu0 %v980_v7 }
 0x13b   :  { %866 = vmatpush3.msra.mxu0 %v280_v63 }
 0x13c   :  { %867 = vmatprep.subr.mxu0 %v980_v7 }
 0x13d   :  { %868 = vmatpush3.msra.mxu0 %v279_v2 }
 0x13e   :  { %869 = vmatprep.subr.mxu0 %v980_v7 }
 0x13f   :  { %870 = vmatpush3.msra.mxu0 %v278_v4 }
 0x140   :  { %871 = vmatprep.subr.mxu0 %v980_v7 }
 0x141   :  { %872 = vmatpush3.msra.mxu0 %v277_v6 }
 0x142   :  { %873 = vmatprep.subr.mxu0 %v980_v7 }
 0x143   :  { %874 = vmatpush3.msra.mxu0 %v276_v9 }
 0x144   :  { %875 = vmatprep.subr.mxu0 %v980_v7 }
 0x145   :  { %876 = vmatpush3.msra.mxu0 %v275_v11 }
 0x146   :  { %899 = vmatprep.subr.mxu0 %v980_v7 }
 0x1f6   :  { %v122_v21 = vpop.f32.mrf.mxu0 }
 0x1f7   :  { %v123_v22 = vadd.f32 %v769_v20, %v122_v21 }
 0x1f8   :  { %v849_v23 = vpop.f32.mrf.mxu0 }
 0x1f9   :  { %956 = vtanh.f32 %v123_v22  ;;  %v464_v23 = vld [vmem:[%s1291_s3 + $0x110] sm:$0xff] }
 0x206   :  { %v957_v24 = vpop.eup %956 }
 0x207   :  { %v128_v25 = vsel %vm127_vm2, %v957_v24, 0.0 }
 0x208   :  { %129 = vadd.xlane.f32.xlu1 %v128_v25 }
 0x291   :  { %v130_v26 = vpop.xlane.xlu1 %129 }
 0x292   :  { %v132_v27 = vmul.f32 0.03125, %v130_v26  ;;  %v463_v26 = vld [vmem:[%s1291_s3 + $0x108] sm:$0xff] }
 0x294   :  { %v133_v28 = vsub.f32 %v957_v24, %v132_v27  ;;  %v547_v24 = vld [vmem:[%s1291_s3 + $0x150] sm:$0xff]  ;;  %v546_v27 = vld [vmem:[%s1291_s3 + $0x148] sm:$0xff] }
 0x296   :  { %v134_v29 = vmul.f32 %v133_v28, %v133_v28 }
 0x298   :  { %v135_v30 = vsel %vm127_vm2, %v134_v29, 0.0  ;;  %v545_v29 = vld [vmem:[%s1291_s3 + $0x140] sm:$0xff] }
 0x299   :  { %136 = vadd.xlane.f32.xlu1 %v135_v30  ;;  %v461_v30 = vld [vmem:[%s1291_s3 + $0xf8] sm:$0xff] }
 0x2aa   :  { %266 = vperm.xlu1 %952, %v263_v45  }
 0x322   :  { %v137_v35 = vpop.xlane.xlu1 %136 }
 0x323   :  { %v138_v36 = vmul.f32 0.03125, %v137_v35  ;;  %v542_v35 = vld [vmem:[%s1291_s3 + $0x128] sm:$0xff] }
 0x325   :  { %v139_v37 = vadd.f32 1e-05, %v138_v36  ;;  %v458_v36 = vld [vmem:[%s1291_s3 + $0xe0] sm:$0xff] }
 0x326   :  { %v267_v61 = vpop.permute.xlu1 %266 }
 0x327   :  { %958 = vrsqrt.f32 %v139_v37  ;;  %v1106_v1 = vmul.f32 %v267_v61, %v262_v60  ;;  %v541_v37 = vld [vmem:[%s1291_s3 + $0x120] sm:$0xff] }
 0x334   :  { %v959_v38 = vpop.eup %958 }
 0x335   :  { %v141_v40 = vmul.f32 %v959_v38, %v133_v28  ;;  %v462_v28 = vld [vmem:[%s1291_s3 + $0x100] sm:$0xff]  ;;  %v457_v38 = vld [vmem:[%s1291_s3 + $0xd8] sm:$0xff] }
 0x337   :  { %v147_v42 = vmul.f32 %v771_v39, %v141_v40  ;;  %v540_v39 = vld [vmem:[%s1291_s3 + $0x118] sm:$0xff]  ;;  %v777_v40 = vld [vmem:[%s1291_s3 + $0x160] ss:$0 sm:$0xff] }
 0x339   :  { %v153_v43 = vadd.f32 %v772_v41, %v147_v42 }
 0x33b   :  { %859 = vmatmul.mubr.msk.f32.vlgmr.msra.gmra.mxu1 %vm127_vm2, %v153_v43 }
 0x33c   :  { %896 = vmatprep.mubr.msk.f32.mxu1 %vm981_vm1, %v980_v7  ;;  %881 = vmatpush3.msra.mxu1 %v375_v58 }
 0x33d   :  { %882 = vmatprep.subr.mxu1 %v980_v7 }
 0x33e   :  { %883 = vmatpush3.msra.mxu1 %v374_v62 }
 0x33f   :  { %884 = vmatprep.subr.mxu1 %v980_v7 }
 0x340   :  { %885 = vmatpush3.msra.mxu1 %v373_v0 }
 0x341   :  { %886 = vmatprep.subr.mxu1 %v980_v7 }
 0x342   :  { %887 = vmatpush3.msra.mxu1 %v372_v3 }
 0x343   :  { %888 = vmatprep.subr.mxu1 %v980_v7 }
 0x344   :  { %889 = vmatpush3.msra.mxu1 %v371_v5 }
 0x345   :  { %890 = vmatprep.subr.mxu1 %v980_v7 }
 0x346   :  { %891 = vmatpush3.msra.mxu1 %v370_v8 }
 0x347   :  { %892 = vmatprep.subr.mxu1 %v980_v7 }
 0x348   :  { %893 = vmatpush3.msra.mxu1 %v369_v10 }
 0x349   :  { %894 = vmatprep.subr.mxu1 %v980_v7 }
 0x34a   :  { %895 = vmatpush3.msra.mxu1 %v368_v12 }
 0x34b   :  { %918 = vmatprep.subr.mxu1 %v980_v7 }
 0x3fb   :  { %v232_v47 = vpop.f32.mrf.mxu1 }
 0x3fc   :  { %v233_v48 = vadd.f32 %v773_v46, %v232_v47  ;;  %v780_v47 = vld [vmem:[%s1291_s3 + $0x161] ss:$0 sm:$0xff] }
 0x3fd   :  { %v860_v49 = vpop.f32.mrf.mxu1 }
 0x3fe   :  { %960 = vtanh.f32 %v233_v48 }
 0x40b   :  { %v961_v50 = vpop.eup %960 }
 0x40c   :  { %v237_v51 = vsel %vm127_vm2, %v961_v50, 0.0 }
 0x40d   :  { %238 = vadd.xlane.f32.xlu0 %v237_v51 }
 0x496   :  { %v239_v52 = vpop.xlane.xlu0 %238 }
 0x497   :  { %v240_v53 = vmul.f32 0.03125, %v239_v52 }
 0x499   :  { %v1078_v54 = vsub.f32 %v961_v50, %v240_v53 }
 0x49b   :  { %v242_v55 = vmul.f32 %v1078_v54, %v1078_v54 }
 0x49d   :  { %v243_v56 = vsel %vm127_vm2, %v242_v55, 0.0 }
 0x49e   :  { %244 = vadd.xlane.f32.xlu0 %v243_v56 }
 0x4b4   :  { %271 = vrot.lane.b32.xlu0 %v1106_v1, %s983_s11 }
 0x527   :  { %v245_v13 = vpop.xlane.xlu0 %244 }
 0x528   :  { %v246_v14 = vmul.f32 0.03125, %v245_v13 }
 0x52a   :  { %v247_v15 = vadd.f32 1e-05, %v246_v14 }
 0x52b   :  { %v272_v21 = vpop.permute.xlu0 %271 }
 0x52c   :  { %962 = vrsqrt.f32 %v247_v15  ;;  %v659_v15 = vld [vmem:[%s1291_s3 + $0x50] sm:$0xff] }
 0x539   :  { %v963_v16 = vpop.eup %962 }
 0x53a   :  { %v249_v18 = vmul.f32 %v963_v16, %v1078_v54  ;;  %v657_v16 = vld [vmem:[%s1291_s3 + $0x40] sm:$0xff] }
 0x53c   :  { %v255_v20 = vmul.f32 %v775_v17, %v249_v18  ;;  %v656_v17 = vld [vmem:[%s1291_s3 + $0x38] sm:$0xff] }
 0x53e   :  { %v1160_v22 = vadd.f32 %v776_v19, %v255_v20 }
 0x540   :  { %v274_v25 = vsel %vm127_vm2, %v1160_v22, %v272_v21 }
 0x541   :  { %878 = vmatmul.mubr.msk.f32.vlgmr.msra.gmra.mxu0 %vm288_vm3, %v274_v25  ;;  %897 = vmatmul.mubr.msk.f32.vlgmr.msra.gmra.mxu1 %vm288_vm3, %v274_v25 }
 0x542   :  { %900 = vmatpush3.msra.mxu0 %v464_v23  ;;  %919 = vmatpush3.msra.mxu1 %v547_v24  ;;  %v787_v23 = vld [vmem:[%s1291_s3 + $0x164] ss:$0 sm:$0xff] }
 0x543   :  { %901 = vmatprep.subr.mxu0 %v980_v7  ;;  %920 = vmatprep.subr.mxu1 %v980_v7 }
 0x544   :  { %902 = vmatpush3.msra.mxu0 %v463_v26  ;;  %921 = vmatpush3.msra.mxu1 %v546_v27 }
 0x545   :  { %903 = vmatprep.subr.mxu0 %v980_v7  ;;  %922 = vmatprep.subr.mxu1 %v980_v7 }
 0x546   :  { %904 = vmatpush3.msra.mxu0 %v462_v28  ;;  %923 = vmatpush3.msra.mxu1 %v545_v29 }
 0x547   :  { %905 = vmatprep.subr.mxu0 %v980_v7  ;;  %924 = vmatprep.subr.mxu1 %v980_v7 }
 0x548   :  { %906 = vmatpush3.msra.mxu0 %v461_v30  ;;  %925 = vmatpush3.msra.mxu1 %v544_v31 }
 0x549   :  { %907 = vmatprep.subr.mxu0 %v980_v7  ;;  %926 = vmatprep.subr.mxu1 %v980_v7 }
 0x54a   :  { %908 = vmatpush3.msra.mxu0 %v460_v32  ;;  %927 = vmatpush3.msra.mxu1 %v543_v33 }
 0x54b   :  { %909 = vmatprep.subr.mxu0 %v980_v7  ;;  %928 = vmatprep.subr.mxu1 %v980_v7 }
 0x54c   :  { %910 = vmatpush3.msra.mxu0 %v459_v34  ;;  %929 = vmatpush3.msra.mxu1 %v542_v35 }
 0x54d   :  { %911 = vmatprep.subr.mxu0 %v980_v7  ;;  %930 = vmatprep.subr.mxu1 %v980_v7 }
 0x54e   :  { %912 = vmatpush3.msra.mxu0 %v458_v36  ;;  %931 = vmatpush3.msra.mxu1 %v541_v37 }
 0x54f   :  { %913 = vmatprep.subr.mxu0 %v980_v7  ;;  %932 = vmatprep.subr.mxu1 %v980_v7 }
 0x550   :  { %914 = vmatpush3.msra.mxu0 %v457_v38  ;;  %915 = vmatprep.mubr.msk.f32.mxu0 %vm981_vm1, %v980_v7  ;;  %v755_v38 = vlaneseq }
 0x551   :  { %933 = vmatpush3.msra.mxu1 %v540_v39  ;;  %934 = vmatprep.mubr.msk.f32.mxu1 %vm981_vm1, %v980_v7 }
 0x552   :  { %916 = vmatmul.mubr.msk.f32.vlgmr.msra.gmra.mxu0 %vm288_vm3, %v274_v25  ;;  %935 = vmatmul.mubr.msk.f32.vlgmr.msra.gmra.mxu1 %vm288_vm3, %v274_v25  ;;  %v788_v25 = vld [vmem:[%s1291_s3 + $0x165] ss:$0 sm:$0xff]  ;;  %v756_v39 = vand.u32 127, %v755_v38 }
 0x553   :  { %937 = vmatprep.subr.mxu0 %v980_v7  ;;  %945 = vmatprep.mubr.msk.f32.mxu0 %vm981_vm1, %v980_v7 }
 0x554   :  { %938 = vmatpush3.msra.mxu0 %v659_v15  ;;  %vm758_vm5 = vcmp.eq.s32.totalorder %v756_v39, 33  ;;  %vm757_vm6 = vcmp.eq.s32.totalorder %v756_v39, 32 }
 0x555   :  { %939 = vmatprep.subr.mxu0 %v980_v7 }
 0x601   :  { %v358_v41 = vpop.f32.mrf.mxu0  ;;  %v447_v42 = vpop.f32.mrf.mxu1 }
 0x602   :  { %v359_v43 = vadd.f32 %v777_v40, %v358_v41  ;;  %v448_v48 = vadd.f32 %v780_v47, %v447_v42 }
 0x603   :  { %v879_v44 = vpop.f32.mrf.mxu0  ;;  %v898_v45 = vpop.f32.mrf.mxu1 }
 0x604   :  { %v779_v46 = vmul.f32 -1.442695, %v359_v43  ;;  %v782_v49 = vmul.f32 -1.442695, %v448_v48 }
 0x606   :  { %964 = vpow2.f32 %v779_v46 }
 0x607   :  { %966 = vpow2.f32 %v782_v49 }
 0x612   :  { %v536_v50 = vpop.f32.mrf.mxu0  ;;  %v619_v51 = vpop.f32.mrf.mxu1 }
 0x613   :  { %v965_v52 = vpop.eup %964  ;;  %v620_v60 = vadd.f32 %v785_v57, %v619_v51  ;;  %v537_v62 = vadd.f32 %v783_v59, %v536_v50 }
 0x614   :  { %v365_v53 = vadd.f32 1.0, %v965_v52  ;;  %v917_v54 = vpop.f32.mrf.mxu0  ;;  %v936_v55 = vpop.f32.mrf.mxu1 }
 0x615   :  { %v967_v56 = vpop.eup %966 }
 0x616   :  { %968 = vrcp.f32 %v365_v53  ;;  %v454_v58 = vadd.f32 1.0, %v967_v56 }
 0x618   :  { %970 = vrcp.f32 %v454_v58 }
 0x623   :  { %v969_v61 = vpop.eup %968 }
 0x624   :  { %v623_v63 = vmul.f32 %v969_v61, %v620_v60 }
 0x625   :  { %v971_v2 = vpop.eup %970 }
 0x626   :  { %v624_v0 = vadd.f32 %v623_v63, %v537_v62  ;;  %v626_v3 = vsub.f32 1.0, %v971_v2  ;;  %v628_v6 = vmul.f32 %v971_v2, %v1106_v1  ;;  %v658_v1 = vld [vmem:[%s1291_s3 + $0x48] sm:$0xff] }
 0x627   :  { %940 = vmatpush3.msra.mxu0 %v658_v1 }
 0x628   :  { %972 = vtanh.f32 %v624_v0  ;;  %941 = vmatprep.subr.mxu0 %v980_v7 }
 0x629   :  { %942 = vmatpush3.msra.mxu0 %v657_v16 }
 0x62a   :  { %943 = vmatprep.subr.mxu0 %v980_v7  ;;  %v789_v7 = vld [vmem:[%s1291_s3 + $0x166] ss:$0 sm:$0xff] }
 0x62b   :  { %944 = vmatpush3.msra.mxu0 %v656_v17 }
 0x635   :  { %v973_v4 = vpop.eup %972 }
 0x636   :  { %v627_v5 = vmul.f32 %v973_v4, %v626_v3 }
 0x638   :  { %v1250_v8 = vadd.f32 %v628_v6, %v627_v5 }
 0x63a   :  { %v630_v9 = vsel %vm127_vm2, %v1250_v8, 0.0 }
 0x63b   :  { %631 = vadd.xlane.f32.xlu1 %v630_v9 }
 0x6c4   :  { %v632_v10 = vpop.xlane.xlu1 %631 }
 0x6c5   :  { %v633_v11 = vmul.f32 0.03125, %v632_v10 }
 0x6c7   :  { %v634_v12 = vsub.f32 %v1250_v8, %v633_v11 }
 0x6c9   :  { %v635_v13 = vmul.f32 %v634_v12, %v634_v12 }
 0x6cb   :  { %v636_v14 = vsel %vm127_vm2, %v635_v13, 0.0 }
 0x6cc   :  { %637 = vadd.xlane.f32.xlu0 %v636_v14 }
 0x755   :  { %v638_v18 = vpop.xlane.xlu0 %637 }
 0x756   :  { %v639_v19 = vmul.f32 0.03125, %v638_v18 }
 0x758   :  { %v640_v20 = vadd.f32 1e-05, %v639_v19 }
 0x75a   :  { %974 = vrsqrt.f32 %v640_v20 }
 0x767   :  { %v975_v21 = vpop.eup %974 }
 0x768   :  { %v642_v24 = vmul.f32 %v975_v21, %v634_v12 }
 0x76a   :  { %v648_v26 = vmul.f32 %v787_v23, %v642_v24 }
 0x76c   :  { %v654_v27 = vadd.f32 %v788_v25, %v648_v26 }
 0x76e   :  { %v655_v28 = vadd.f32 %v654_v27, %v1160_v22 }
 0x770   :  { %946 = vmatmul.mubr.msk.f32.vlgmr.msra.gmra.mxu0 %vm127_vm2, %v655_v28 }
 0x830   :  { %v734_v29 = vpop.f32.mrf.mxu0 }
 0x831   :  { %v735_v30 = vadd.f32 %v789_v7, %v734_v29 }
 0x832   :  { %v947_v31 = vpop.f32.mrf.mxu0 }
 0x833   :  { %v739_v32 = vsel %vm738_vm4, %v735_v30, -inf }
 0x834   :  { %752 = vmax.index.xlane.f32.xlu0 %v739_v32  ;;  %740 = vmax.xlane.f32.xlu1 %v739_v32 }
 0x8bd   :  { %v741_v33 = vpop.xlane.xlu1 %740  ;;  %v753_v40 = vpop.xlane.xlu0 %752 }
 0x8be   :  { %v742_v34 = vsub.f32 %v735_v30, %v741_v33  ;;  %v754_v43 = vcvt.s32.f32 %v753_v40 }
 0x8c0   :  { %v743_v35 = vmul.f32 1.442695, %v742_v34  ;;  %v759_v46 = vsel %vm758_vm5, %v754_v43, 0.0 }
 0x8c2   :  { %976 = vpow2.f32 %v743_v35 }
 0x8cf   :  { %v977_v36 = vpop.eup %976 }
 0x8d0   :  { %v745_v37 = vsel %vm738_vm4, %v977_v36, 0.0 }
 0x8d1   :  { %746 = vadd.xlane.f32.xlu1 %v745_v37 }
 0x95a   :  { %v747_v22 = vpop.xlane.xlu1 %746 }
 0x95b   :  { %978 = vlog2.f32 %v747_v22 }
 0x968   :  { %v979_v41 = vpop.eup %978 }
 0x969   :  { %v749_v42 = vmul.f32 0.6931472, %v979_v41 }
 0x96b   :  { %v750_v44 = vadd.f32 %v749_v42, %v741_v33 }
 0x96d   :  { %v751_v45 = vsub.f32 %v741_v33, %v750_v44 }
 0x96f   :  { %v760_v47 = vsel %vm757_vm6, %v751_v45, %v759_v46 }
 0x970   :  { %761 = vst [vmem:[%s1294_s4] sm:$0xff] %v760_v47 }
 0x971   :  { %762 = vst.msk [vmem:[%s1294_s4] sm:$0xff] %vm127_vm2, %v1250_v8 }

</bundles_post_ra>
